<compile_context>
chip_gen: v5e
topology: v5e:2x2
jax: 0.10.0
libtpu: 0.0.40
codegen_flags: <defaults>
</compile_context>

<pallas_src>
import jax
import jax.numpy as jnp
from jax.experimental import pallas as pl
from jax.experimental.pallas import tpu as pltpu

HIDDEN1_UNITS = 300
HIDDEN2_UNITS = 600

LANE = 128
H1_PAD = ((HIDDEN1_UNITS + LANE - 1) // LANE) * LANE   # 384
H2_PAD = ((HIDDEN2_UNITS + LANE - 1) // LANE) * LANE   # 640
OUT_PAD = LANE                                         # 128 (real outputs in cols 0..2)

MAX_TILE_B = 1024   # review sweep point (512-1024); ~10 MiB residency at 1024, far < VMEM


def _round_up(n, m):
    return ((n + m - 1) // m) * m


def _pick_tile_b(B, max_tile=MAX_TILE_B, min_grid=2):
    """Tail-aware batch-tile choice.

    Guarantees: multiple of 8 (sublane constraint), <= max_tile, >= min_grid grid steps
    whenever round_up(B, 8) > 8 (so the "parallel" batch axis shards across v7x's two
    TensorCores; harmless on single-TC v5e/v6e), and padding waste < 8 rows per step
    instead of up to a full tile.
    """
    b8 = _round_up(max(B, 1), 8)
    if b8 <= 8:
        return 8
    n_steps = max(min_grid, -(-b8 // max_tile))
    return min(max_tile, _round_up(-(-b8 // n_steps), 8))


def _vmem_ceiling_bytes():
    """Per-generation VMEM ceiling: 3/4 of the chip's capacity (conservative fallback 64 MiB)."""
    try:
        cap = int(pltpu.get_tpu_info().vmem_capacity_bytes)
    except Exception:
        cap = 64 << 20   # v7x per-TC VMEM; safe on v5e/v6e too
    return (cap * 3) // 4


def simplenet_kernel(x_ref, w1_ref, b1_ref, w2_ref, b2_ref, wh_ref, bh_ref, o_ref):
    # fc1 + relu  (x already bf16; MXU matmul with f32 accumulation; padded lanes stay 0)
    h1 = jnp.dot(x_ref[...], w1_ref[...], preferred_element_type=jnp.float32) + b1_ref[...]
    h1 = jnp.maximum(h1, 0.0).astype(jnp.bfloat16)

    # fc2 + relu
    h2 = jnp.dot(h1, w2_ref[...], preferred_element_type=jnp.float32) + b2_ref[...]
    h2 = jnp.maximum(h2, 0.0).astype(jnp.bfloat16)

    # three 600->1 heads fused into one lane-dense (H2_PAD, 128) matmul
    z = jnp.dot(h2, wh_ref[...], preferred_element_type=jnp.float32) + bh_ref[...]

    # lane 0 -> tanh, other lanes -> sigmoid.  Single EUP sigmoid over the block:
    # tanh(z) == 2*sigmoid(2z) - 1.
    col = jax.lax.broadcasted_iota(jnp.int32, z.shape, 1)
    is_steer = col == 0
    s = jax.nn.sigmoid(jnp.where(is_steer, 2.0 * z, z))
    o_ref[...] = jnp.where(is_steer, 2.0 * s - 1.0, s)


def simplenet_forward(x, w1, b1, w2, b2, wh, bh, *, tile_b=None):
    B, insize = x.shape
    h1p, h2p, outp = w1.shape[1], w2.shape[1], wh.shape[1]

    if tile_b is None:
        tile_b = _pick_tile_b(B)
    elif tile_b <= 0 or tile_b % 8 != 0:
        raise ValueError(f"tile_b must be a positive multiple of 8, got {tile_b}")

    # Cast x to bf16 in the wrapper (halves x DMA); accumulation stays f32 on the MXU.
    x = x.astype(jnp.bfloat16)
    b_pad = _round_up(max(B, 1), tile_b)
    if b_pad != B:
        x = jnp.pad(x, ((0, b_pad - B), (0, 0)))
    grid = (b_pad // tile_b,)

    # VMEM limit from the actual resident footprint, clamped to the chip's capacity:
    #   weights/biases (double-buffer allocation) + 2x x/out tiles + live activations.
    weight_bytes = sum(int(a.size) * a.dtype.itemsize for a in (w1, b1, w2, b2, wh, bh))
    io_bytes = 2 * tile_b * (insize * 2 + outp * 4)          # bf16 x, f32 out
    act_bytes = tile_b * (h1p + h2p) * (4 + 2)               # f32 acts + bf16 recasts
    vmem_limit = int(min(_vmem_ceiling_bytes(),
                         max(16 << 20, 2 * (weight_bytes + io_bytes + act_bytes))))

    cost = pl.CostEstimate(
        flops=2 * b_pad * (insize * h1p + h1p * h2p + h2p * outp),
        transcendentals=b_pad * outp,
        bytes_accessed=weight_bytes + b_pad * insize * 2 + b_pad * outp * 4,
    )

    out = pl.pallas_call(
        simplenet_kernel,
        out_shape=jax.ShapeDtypeStruct((b_pad, outp), jnp.float32),
        grid=grid,
        in_specs=[
            pl.BlockSpec((tile_b, insize), lambda i: (i, 0)),   # x: tiled over batch
            pl.BlockSpec((insize, h1p), lambda i: (0, 0)),      # w1: VMEM-resident
            pl.BlockSpec((1, h1p), lambda i: (0, 0)),           # b1: resident
            pl.BlockSpec((h1p, h2p), lambda i: (0, 0)),         # w2: resident
            pl.BlockSpec((1, h2p), lambda i: (0, 0)),           # b2: resident
            pl.BlockSpec((h2p, outp), lambda i: (0, 0)),        # wh: resident
            pl.BlockSpec((1, outp), lambda i: (0, 0)),          # bh: resident
        ],
        out_specs=pl.BlockSpec((tile_b, outp), lambda i: (i, 0)),
        compiler_params=pltpu.CompilerParams(
            dimension_semantics=("parallel",),
            vmem_limit_bytes=vmem_limit,
        ),
        cost_estimate=cost,
    )(x, w1, b1, w2, b2, wh, bh)

    # Drop batch padding and the 125 zero head lanes.
    return out[:B, :3]


def init_params(key, insize):
    """Init mirroring SimpleNet.__init__, stored transposed (in, out), zero-padded, bf16 weights.

    fc1/fc2 weights+biases: uniform(-1/sqrt(fan_in), 1/sqrt(fan_in)) like torch default.
    Head weights: normal(0, 0.0001). Heads stacked as columns 0..2 of a (H2_PAD, 128) matrix.
    Padded rows/cols/bias entries are exactly zero so ReLU/matmul numerics are unchanged.
    """
    k = jax.random.split(key, 6)

    bnd1 = 1.0 / float(insize) ** 0.5
    w1 = jax.random.uniform(k[0], (insize, HIDDEN1_UNITS), jnp.float32, -bnd1, bnd1)
    b1 = jax.random.uniform(k[1], (1, HIDDEN1_UNITS), jnp.float32, -bnd1, bnd1)

    bnd2 = 1.0 / float(HIDDEN1_UNITS) ** 0.5
    w2 = jax.random.uniform(k[2], (HIDDEN1_UNITS, HIDDEN2_UNITS), jnp.float32, -bnd2, bnd2)
    b2 = jax.random.uniform(k[3], (1, HIDDEN2_UNITS), jnp.float32, -bnd2, bnd2)

    bnd3 = 1.0 / float(HIDDEN2_UNITS) ** 0.5
    wh = 0.0001 * jax.random.normal(k[4], (HIDDEN2_UNITS, 3), jnp.float32)
    bh = jax.random.uniform(k[5], (1, 3), jnp.float32, -bnd3, bnd3)

    # Zero-pad to lane-aligned shapes.
    w1 = jnp.pad(w1, ((0, 0), (0, H1_PAD - HIDDEN1_UNITS)))
    b1 = jnp.pad(b1, ((0, 0), (0, H1_PAD - HIDDEN1_UNITS)))
    w2 = jnp.pad(w2, ((0, H1_PAD - HIDDEN1_UNITS), (0, H2_PAD - HIDDEN2_UNITS)))
    b2 = jnp.pad(b2, ((0, 0), (0, H2_PAD - HIDDEN2_UNITS)))
    wh = jnp.pad(wh, ((0, H2_PAD - HIDDEN2_UNITS), (0, OUT_PAD - 3)))
    bh = jnp.pad(bh, ((0, 0), (0, OUT_PAD - 3)))

    # Weights in bf16 (halves weight DMA); biases stay f32.
    return (w1.astype(jnp.bfloat16), b1, w2.astype(jnp.bfloat16), b2,
            wh.astype(jnp.bfloat16), bh)


def reference_forward(x, w1, b1, w2, b2, wh, bh):
    """Pure-JAX reference emulating the kernel's bf16 inputs / f32 accumulation."""
    xb = x.astype(jnp.bfloat16).astype(jnp.float32)
    h1 = jax.nn.relu(xb @ w1.astype(jnp.float32) + b1)
    h1 = h1.astype(jnp.bfloat16).astype(jnp.float32)
    h2 = jax.nn.relu(h1 @ w2.astype(jnp.float32) + b2)
    h2 = h2.astype(jnp.bfloat16).astype(jnp.float32)
    z = (h2 @ wh.astype(jnp.float32) + bh)[:, :3]
    return jnp.concatenate(
        [jnp.tanh(z[:, 0:1]), jax.nn.sigmoid(z[:, 1:2]), jax.nn.sigmoid(z[:, 2:3])], axis=1
    )


if __name__ == "__main__":
    key = jax.random.PRNGKey(0)
    kx, kx2, kp = jax.random.split(key, 3)

    INSIZE = 16
    params = init_params(kp, INSIZE)

    # Small demo batch (single grid step).
    B = 2
    x = jax.random.normal(kx, (B, INSIZE), jnp.float32)
    out = jax.block_until_ready(simplenet_forward(x, *params))
    ref = reference_forward(x, *params)
    assert out.shape == (B, 3)
    assert jnp.allclose(out, ref, atol=5e-3, rtol=5e-2), "mismatch vs. reference (B=2)"

    # Slightly larger batch to exercise the tail-aware, multi-step (megacore-shardable) grid.
    B2 = 40
    x2 = jax.random.normal(kx2, (B2, INSIZE), jnp.float32)
    out2 = jax.block_until_ready(simplenet_forward(x2, *params))
    ref2 = reference_forward(x2, *params)
    assert out2.shape == (B2, 3)
    assert jnp.allclose(out2, ref2, atol=5e-3, rtol=5e-2), "mismatch vs. reference (B=40)"

    print("KERNEL_OK")
</pallas_src>

<mosaic_0001>
module attributes {stable_mosaic.version = 11 : i64} {
  func.func @simplenet_kernel(%arg0: i32, %arg1: memref<8x16xbf16, #tpu.memory_space<vmem>>, %arg2: memref<16x384xbf16, #tpu.memory_space<vmem>>, %arg3: memref<1x384xf32, #tpu.memory_space<vmem>>, %arg4: memref<384x640xbf16, #tpu.memory_space<vmem>>, %arg5: memref<1x640xf32, #tpu.memory_space<vmem>>, %arg6: memref<640x128xbf16, #tpu.memory_space<vmem>>, %arg7: memref<1x128xf32, #tpu.memory_space<vmem>>, %arg8: memref<8x128xf32, #tpu.memory_space<vmem>>) attributes {dimension_semantics = [#tpu.dimension_semantics<parallel>], iteration_bounds = array<i64: 1>, scalar_prefetch = 0 : i64, scratch_operands = 0 : i64, tpu.core_type = #tpu.core_type<tc>, window_params = [{transform_indices = @transform_0, window_bounds = array<i64: 8, 16>}, {pipeline_mode = #tpu.pipeline_mode<synchronous>, transform_indices = @transform_1, window_bounds = array<i64: 16, 384>}, {pipeline_mode = #tpu.pipeline_mode<synchronous>, transform_indices = @transform_2, window_bounds = array<i64: 1, 384>}, {pipeline_mode = #tpu.pipeline_mode<synchronous>, transform_indices = @transform_3, window_bounds = array<i64: 384, 640>}, {pipeline_mode = #tpu.pipeline_mode<synchronous>, transform_indices = @transform_4, window_bounds = array<i64: 1, 640>}, {pipeline_mode = #tpu.pipeline_mode<synchronous>, transform_indices = @transform_5, window_bounds = array<i64: 640, 128>}, {pipeline_mode = #tpu.pipeline_mode<synchronous>, transform_indices = @transform_6, window_bounds = array<i64: 1, 128>}, {transform_indices = @transform_7, window_bounds = array<i64: 8, 128>}]} {
    %c0 = arith.constant 0 : index
    %c0_0 = arith.constant 0 : index
    %0 = vector.load %arg1[%c0, %c0_0] : memref<8x16xbf16, #tpu.memory_space<vmem>>, vector<8x16xbf16>
    %c0_1 = arith.constant 0 : index
    %c0_2 = arith.constant 0 : index
    %1 = vector.load %arg2[%c0_1, %c0_2] : memref<16x384xbf16, #tpu.memory_space<vmem>>, vector<16x384xbf16>
    %cst = arith.constant dense<0.000000e+00> : vector<8x384xf32>
    %2 = tpu.matmul %0, %1, %cst {dimension_numbers = #tpu.dot_dimension_numbers<[1], [0], [0], [1], [0, 0, 1, 1], [], []>} : vector<8x16xbf16>, vector<16x384xbf16>, vector<8x384xf32> -> vector<8x384xf32>
    %c0_3 = arith.constant 0 : index
    %c0_4 = arith.constant 0 : index
    %3 = vector.load %arg3[%c0_3, %c0_4] : memref<1x384xf32, #tpu.memory_space<vmem>>, vector<1x384xf32>
    %4 = vector.broadcast %3 : vector<1x384xf32> to vector<8x384xf32>
    %5 = arith.addf %2, %4 : vector<8x384xf32>
    %cst_5 = arith.constant 0.000000e+00 : f32
    %6 = vector.broadcast %cst_5 : f32 to vector<8x384xf32>
    %7 = arith.maximumf %5, %6 : vector<8x384xf32>
    %8 = arith.truncf %7 : vector<8x384xf32> to vector<8x384xbf16>
    %c0_6 = arith.constant 0 : index
    %c0_7 = arith.constant 0 : index
    %9 = vector.load %arg4[%c0_6, %c0_7] : memref<384x640xbf16, #tpu.memory_space<vmem>>, vector<384x640xbf16>
    %cst_8 = arith.constant dense<0.000000e+00> : vector<8x640xf32>
    %10 = tpu.matmul %8, %9, %cst_8 {dimension_numbers = #tpu.dot_dimension_numbers<[1], [0], [0], [1], [0, 0, 1, 1], [], []>} : vector<8x384xbf16>, vector<384x640xbf16>, vector<8x640xf32> -> vector<8x640xf32>
    %c0_9 = arith.constant 0 : index
    %c0_10 = arith.constant 0 : index
    %11 = vector.load %arg5[%c0_9, %c0_10] : memref<1x640xf32, #tpu.memory_space<vmem>>, vector<1x640xf32>
    %12 = vector.broadcast %11 : vector<1x640xf32> to vector<8x640xf32>
    %13 = arith.addf %10, %12 : vector<8x640xf32>
    %cst_11 = arith.constant 0.000000e+00 : f32
    %14 = vector.broadcast %cst_11 : f32 to vector<8x640xf32>
    %15 = arith.maximumf %13, %14 : vector<8x640xf32>
    %16 = arith.truncf %15 : vector<8x640xf32> to vector<8x640xbf16>
    %c0_12 = arith.constant 0 : index
    %c0_13 = arith.constant 0 : index
    %17 = vector.load %arg6[%c0_12, %c0_13] : memref<640x128xbf16, #tpu.memory_space<vmem>>, vector<640x128xbf16>
    %cst_14 = arith.constant dense<0.000000e+00> : vector<8x128xf32>
    %18 = tpu.matmul %16, %17, %cst_14 {dimension_numbers = #tpu.dot_dimension_numbers<[1], [0], [0], [1], [0, 0, 1, 1], [], []>} : vector<8x640xbf16>, vector<640x128xbf16>, vector<8x128xf32> -> vector<8x128xf32>
    %c0_15 = arith.constant 0 : index
    %c0_16 = arith.constant 0 : index
    %19 = vector.load %arg7[%c0_15, %c0_16] : memref<1x128xf32, #tpu.memory_space<vmem>>, vector<1x128xf32>
    %20 = vector.broadcast %19 : vector<1x128xf32> to vector<8x128xf32>
    %21 = arith.addf %18, %20 : vector<8x128xf32>
    %22 = tpu.iota {dimensions = array<i32: 1>} : vector<8x128xi32>
    %c0_i32 = arith.constant 0 : i32
    %23 = vector.broadcast %c0_i32 : i32 to vector<8x128xi32>
    %24 = arith.cmpi eq, %22, %23 : vector<8x128xi32>
    %cst_17 = arith.constant 2.000000e+00 : f32
    %25 = vector.broadcast %cst_17 : f32 to vector<8x128xf32>
    %26 = arith.mulf %25, %21 : vector<8x128xf32>
    %27 = arith.select %24, %26, %21 : vector<8x128xi1>, vector<8x128xf32>
    %28 = arith.negf %27 : vector<8x128xf32>
    %29 = math.exp %28 : vector<8x128xf32>
    %cst_18 = arith.constant 1.000000e+00 : f32
    %30 = vector.broadcast %cst_18 : f32 to vector<8x128xf32>
    %31 = arith.addf %30, %29 : vector<8x128xf32>
    %32 = arith.divf %30, %31 : vector<8x128xf32>
    %cst_19 = arith.constant 2.000000e+00 : f32
    %33 = vector.broadcast %cst_19 : f32 to vector<8x128xf32>
    %34 = arith.mulf %33, %32 : vector<8x128xf32>
    %cst_20 = arith.constant 1.000000e+00 : f32
    %35 = vector.broadcast %cst_20 : f32 to vector<8x128xf32>
    %36 = arith.subf %34, %35 : vector<8x128xf32>
    %37 = arith.select %24, %36, %32 : vector<8x128xi1>, vector<8x128xf32>
    %c0_21 = arith.constant 0 : index
    %c0_22 = arith.constant 0 : index
    %38 = vector.load %arg8[%c0_21, %c0_22] : memref<8x128xf32, #tpu.memory_space<vmem>>, vector<8x128xf32>
    tpu.vector_store %arg8[%c0_21, %c0_22], %37 {strides = array<i32>} : memref<8x128xf32, #tpu.memory_space<vmem>>, vector<8x128xf32>,
    return
  }
  func.func @transform_0(%arg0: i32) -> (i32, i32) {
    %c0_i32 = arith.constant 0 : i32
    %c0_i32_0 = arith.constant 0 : i32
    return %arg0, %c0_i32 : i32, i32
  }
  func.func @transform_1(%arg0: i32) -> (i32, i32) {
    %c0_i32 = arith.constant 0 : i32
    %c0_i32_0 = arith.constant 0 : i32
    %c0_i32_1 = arith.constant 0 : i32
    return %c0_i32, %c0_i32_0 : i32, i32
  }
  func.func @transform_2(%arg0: i32) -> (i32, i32) {
    %c0_i32 = arith.constant 0 : i32
    %c0_i32_0 = arith.constant 0 : i32
    %c0_i32_1 = arith.constant 0 : i32
    return %c0_i32, %c0_i32_0 : i32, i32
  }
  func.func @transform_3(%arg0: i32) -> (i32, i32) {
    %c0_i32 = arith.constant 0 : i32
    %c0_i32_0 = arith.constant 0 : i32
    %c0_i32_1 = arith.constant 0 : i32
    return %c0_i32, %c0_i32_0 : i32, i32
  }
  func.func @transform_4(%arg0: i32) -> (i32, i32) {
    %c0_i32 = arith.constant 0 : i32
    %c0_i32_0 = arith.constant 0 : i32
    %c0_i32_1 = arith.constant 0 : i32
    return %c0_i32, %c0_i32_0 : i32, i32
  }
  func.func @transform_5(%arg0: i32) -> (i32, i32) {
    %c0_i32 = arith.constant 0 : i32
    %c0_i32_0 = arith.constant 0 : i32
    %c0_i32_1 = arith.constant 0 : i32
    return %c0_i32, %c0_i32_0 : i32, i32
  }
  func.func @transform_6(%arg0: i32) -> (i32, i32) {
    %c0_i32 = arith.constant 0 : i32
    %c0_i32_0 = arith.constant 0 : i32
    %c0_i32_1 = arith.constant 0 : i32
    return %c0_i32, %c0_i32_0 : i32, i32
  }
  func.func @transform_7(%arg0: i32) -> (i32, i32) {
    %c0_i32 = arith.constant 0 : i32
    %c0_i32_0 = arith.constant 0 : i32
    return %arg0, %c0_i32 : i32, i32
  }
}

</mosaic_0001>

<bundles_post_ra>
// kernel: tpu_custom_call.1
= control target key start
LH: loop header
LB: loop body
LE: loop exit
PB: predicated region body
PF: predicated region fallthrough
CT: control target
= control target key end

     0   :  { %12 = vsyncpa [#allocation3], 0  ;;  %s2742_s0 = inlined_call_operand.hbm [shape: bf16[8,16], index: 0, kind: input, shape index: {}]   ;;  %s2743_s1 = inlined_call_operand.hbm [shape: bf16[16,384], index: 1, kind: input, shape index: {}]   ;;  %s2744_s2 = inlined_call_operand.hbm [shape: f32[1,384], index: 2, kind: input, shape index: {}]   ;;  %s2745_s3 = inlined_call_operand.hbm [shape: bf16[384,640], index: 3, kind: input, shape index: {}]   ;;  %s2746_s4 = inlined_call_operand.hbm [shape: f32[1,640], index: 4, kind: input, shape index: {}]   ;;  %s2747_s5 = inlined_call_operand.hbm [shape: bf16[640,128], index: 5, kind: input, shape index: {}]   ;;  %s2748_s6 = inlined_call_operand.vmem [shape: f32[1,128], index: 6, kind: input, shape index: {}]   ;;  %s2749_s7 = inlined_call_operand.hbm [shape: f32[8,128], index: 7, kind: output, shape index: {}]  }
   0x1   :  { %13 = vsyncpa [#allocation6], 0 }
   0x2   :  { %14 = vsyncpa [#allocation9], 0 }
   0x3   :  { %15 = vsyncpa [#allocation12], 0  ;;  %s32_s26 = sshll.u32 %s2743_s1, 4  ;;  %s33_s26 = int_to_ptr.hbm [resolvable:$true] %s32_s26 }
   0x4   :  { %16 = vsyncpa [#allocation4], 0  ;;  %s2632_s27 = smov [#allocation5]   ;;  %s56_s8 = sshll.u32 %s2745_s3, 4  ;;  %s57_s8 = int_to_ptr.hbm [resolvable:$true] %s56_s8 }
   0x5   :  { %s34_s28 = sshll.u32 %s2632_s27, 4  ;;  %s2633_s9 = smov 192   ;;  %s35_s28 = int_to_ptr.vmem [resolvable:$true] %s34_s28 }
   0x6   :  { %s2634_s10 = smov 12   ;;  %s2635_s11 = smov [#allocation8]  }
   0x7   :  { %40 = dma.hbm_to_vmem [thread:$0]  %s33_s26, 384, %s35_s28, [#allocation6], %s2633_s9, %s2633_s9, %s2634_s10  }
   0x8   :  { %s58_s12 = sshll.u32 %s2635_s11, 4  ;;  %s2636_s13 = smov 320   ;;  %s59_s12 = int_to_ptr.vmem [resolvable:$true] %s58_s12 }
   0x9   :  { %s2637_s14 = smov 20   ;;  %s22_s16 = sshll.u32 %s2742_s0, 4  ;;  %s23_s16 = int_to_ptr.hbm [resolvable:$true] %s22_s16 }
   0xa   :  { %64 = dma.hbm_to_vmem [thread:$0]  %s57_s8, 15360, %s59_s12, [#allocation9], %s2636_s13, %s2636_s13, %s2637_s14  }
   0xb   :  { %s2638_s17 = smov [#allocation2]   ;;  %s46_s20 = sshll.u32 %s2744_s2, 4  ;;  %s47_s20 = int_to_ptr.hbm [resolvable:$true] %s46_s20 }
   0xc   :  { %s24_s18 = sshll.u32 %s2638_s17, 4  ;;  %s2639_s21 = smov [#allocation7]   ;;  %s25_s18 = int_to_ptr.vmem [resolvable:$true] %s24_s18 }
   0xd   :  { %27 = dma.hbm_to_vmem [thread:$0]  %s23_s16, 64, %s25_s18, [#allocation3]  }
   0xe   :  { %s48_s22 = sshll.u32 %s2639_s21, 4  ;;  %s70_s25 = sshll.u32 %s2746_s4, 4  ;;  %s49_s22 = int_to_ptr.vmem [resolvable:$true] %s48_s22  ;;  %s71_s25 = int_to_ptr.hbm [resolvable:$true] %s70_s25 }
   0xf   :  { %51 = dma.hbm_to_vmem [thread:$0]  %s47_s20, 48, %s49_s22, [#allocation6]  }
  0x10   :  { %s80_s27 = sshll.u32 %s2747_s5, 4  ;;  %s2640_s28 = smov [#allocation10]   ;;  %s81_s27 = int_to_ptr.hbm [resolvable:$true] %s80_s27 }
  0x11   :  { %s72_s29 = sshll.u32 %s2640_s28, 4  ;;  %s2641_s2 = smov [#allocation11]   ;;  %s73_s29 = int_to_ptr.vmem [resolvable:$true] %s72_s29 }
  0x12   :  { %75 = dma.hbm_to_vmem [thread:$0]  %s71_s25, 80, %s73_s29, [#allocation9]  }
  0x13   :  { %s82_s30 = sshll.u32 %s2641_s2, 4  ;;  %s2642_s8 = smov 64   ;;  %s83_s30 = int_to_ptr.vmem [resolvable:$true] %s82_s30 }
  0x14   :  { %s2643_s9 = smov 4  }
  0x15   :  { %88 = dma.hbm_to_vmem [thread:$0]  %s81_s27, 5120, %s83_s30, [#allocation12], %s2642_s8, %s2642_s8, %s2643_s9  }
  0x16   :  { %2622 = dma.done.wait [#allocation3], 64  }
  0x17   :  { %2623 = vsyncadd [#allocation3], 4294967232 }
  0x18   :  { %2624 = dma.done.wait [#allocation6], 432  }
  0x19   :  { %2625 = vsyncadd [#allocation6], 4294966864 }
  0x1a   :  { %2626 = dma.done.wait [#allocation9], 15440  }
  0x1b   :  { %2627 = vsyncadd [#allocation9], 4294951856 }
  0x1c   :  { %2628 = dma.done.wait [#allocation12], 5120  }
  0x1d   :  { %2629 = vsyncadd [#allocation12], 4294962176  ;;  %vm145_vm0 = vcmask 130048   ;;  %v1618_v0 = vld [vmem:[#allocation5] sm:$0xf]  ;;  %s1603_s13 = sshll.u32 %s2749_s7, 4  ;;  %s1604_s13 = int_to_ptr.hbm [resolvable:$true] %s1603_s13 }
  0x1e   :  { %v2274_v1 = vld [vmem:[#allocation5 + $0x8] sm:$0xf0]  ;;  %v2273_v2 = vld [vmem:[#allocation5 + $0x4] sm:$0xf]  ;;  %v1620_v4 = vld [vmem:[#allocation5 + $0xc] sm:$0xf0] }
  0x1f   :  { %v1619_v3 = vor.u32 %v2274_v1, %v1618_v0  ;;  %v1626_v5 = vld [vmem:[#allocation5 + $0x8] sm:$0xf]  ;;  %v2275_v6 = vld [vmem:[#allocation5 + $0x10] sm:$0xf0]  ;;  %v1623_v7 = vor.u32 %v2273_v2, %v1620_v4  ;;  %v116_v9 = vld [vmem:[#allocation2] sm:$0xf] }
  0x20   :  { %v1627_v8 = vor.u32 %v2275_v6, %v1626_v5  ;;  %v1773_v10 = vld [vmem:[#allocation8 + $0x118] sm:$0xf]  ;;  %v2313_v11 = vld [vmem:[#allocation8 + $0x128] sm:$0xf0]  ;;  %v2311_v15 = vld [vmem:[#allocation8 + $0x11c] sm:$0xf] }
  0x21   :  { %156 = vmatpush.bf16.msra.mxu0 %v1619_v3  ;;  %v1774_v12 = vor.u32 %v2313_v11, %v1773_v10  ;;  %v1933_v13 = vld [vmem:[#allocation8 + $0x258] sm:$0xf]  ;;  %v2353_v14 = vld [vmem:[#allocation8 + $0x268] sm:$0xf0]  ;;  %169 = vmatpush.bf16.msra.mxu1 %v1623_v7  ;;  %v1775_v17 = vld [vmem:[#allocation8 + $0x12c] sm:$0xf0] }
  0x22   :  { %182 = vmatpush.bf16.msra.mxu2 %v1627_v8  ;;  %v1934_v16 = vor.u32 %v2353_v14, %v1933_v13  ;;  %v1753_v18 = vld [vmem:[#allocation8 + $0xf0] sm:$0xf]  ;;  %v2308_v19 = vld [vmem:[#allocation8 + $0x100] sm:$0xf0]  ;;  %v1778_v20 = vor.u32 %v2311_v15, %v1775_v17  ;;  %v2306_v24 = vld [vmem:[#allocation8 + $0xf4] sm:$0xf] }
  0x23   :  { %974 = vmatpush.bf16.msra.mxu3 %v1774_v12  ;;  %v1754_v21 = vor.u32 %v2308_v19, %v1753_v18  ;;  %v1913_v22 = vld [vmem:[#allocation8 + $0x230] sm:$0xf]  ;;  %v2348_v23 = vld [vmem:[#allocation8 + $0x240] sm:$0xf0]  ;;  %v1755_v25 = vld [vmem:[#allocation8 + $0x104] sm:$0xf0] }
  0x24   :  { %1628 = vmatmul.msk.bf16.vlgmr.msra.gmra.mxu0 %vm145_vm0, %v116_v9  ;;  %v2093_v26 = vld [vmem:[#allocation8 + $0x398] sm:$0xf]  ;;  %v2393_v27 = vld [vmem:[#allocation8 + $0x3a8] sm:$0xf0]  ;;  %1629 = vmatmul.msk.bf16.vlgmr.msra.gmra.mxu1 %vm145_vm0, %v116_v9  ;;  %v1733_v29 = vld [vmem:[#allocation8 + $0xc8] sm:$0xf]  ;;  %v1914_v31 = vor.u32 %v2348_v23, %v1913_v22  ;;  %v1758_v32 = vor.u32 %v2306_v24, %v1755_v25 }
  0x25   :  { %1630 = vmatmul.msk.bf16.vlgmr.msra.gmra.mxu2 %vm145_vm0, %v116_v9  ;;  %v2094_v28 = vor.u32 %v2393_v27, %v2093_v26  ;;  %v2303_v30 = vld [vmem:[#allocation8 + $0xd8] sm:$0xf0]  ;;  %987 = vmatpush.bf16.msrb.mxu0 %v1934_v16  ;;  %v1893_v33 = vld [vmem:[#allocation8 + $0x208] sm:$0xf]  ;;  %v2301_v35 = vld [vmem:[#allocation8 + $0xcc] sm:$0xf] }
  0x26   :  { %1013 = vmatpush.bf16.msrb.mxu2 %v1778_v20  ;;  %v2343_v34 = vld [vmem:[#allocation8 + $0x218] sm:$0xf0]  ;;  %v1734_v36 = vor.u32 %v2303_v30, %v1733_v29  ;;  %v1735_v37 = vld [vmem:[#allocation8 + $0xdc] sm:$0xf0]  ;;  %v2073_v38 = vld [vmem:[#allocation8 + $0x370] sm:$0xf] }
  0x27   :  { %975 = vmatpush.bf16.msra.mxu3 %v1754_v21  ;;  %1000 = vmatpush.bf16.msrb.mxu1 %v2094_v28  ;;  %v2388_v39 = vld [vmem:[#allocation8 + $0x380] sm:$0xf0]  ;;  %v1713_v41 = vld [vmem:[#allocation8 + $0xa0] sm:$0xf]  ;;  %v2298_v42 = vld [vmem:[#allocation8 + $0xb0] sm:$0xf0]  ;;  %v1894_v44 = vor.u32 %v2343_v34, %v1893_v33  ;;  %v1738_v45 = vor.u32 %v2301_v35, %v1735_v37 }
  0x28   :  { %v2074_v40 = vor.u32 %v2388_v39, %v2073_v38  ;;  %v2053_v43 = vld [vmem:[#allocation8 + $0x348] sm:$0xf]  ;;  %v1873_v46 = vld [vmem:[#allocation8 + $0x1e0] sm:$0xf]  ;;  %v2338_v47 = vld [vmem:[#allocation8 + $0x1f0] sm:$0xf0]  ;;  %v1714_v49 = vor.u32 %v2298_v42, %v1713_v41 }
  0x29   :  { %988 = vmatpush.bf16.msrb.mxu0 %v1914_v31  ;;  %v2383_v48 = vld [vmem:[#allocation8 + $0x358] sm:$0xf0]  ;;  %v2296_v50 = vld [vmem:[#allocation8 + $0xa4] sm:$0xf]  ;;  %v1715_v51 = vld [vmem:[#allocation8 + $0xb4] sm:$0xf0]  ;;  %v1874_v57 = vor.u32 %v2338_v47, %v1873_v46 }
  0x2a   :  { %1014 = vmatpush.bf16.msrb.mxu2 %v1758_v32  ;;  %v2054_v52 = vor.u32 %v2383_v48, %v2053_v43  ;;  %v1693_v53 = vld [vmem:[#allocation8 + $0x78] sm:$0xf]  ;;  %v2293_v54 = vld [vmem:[#allocation8 + $0x88] sm:$0xf0]  ;;  %v2033_v55 = vld [vmem:[#allocation8 + $0x320] sm:$0xf]  ;;  %v1718_v58 = vor.u32 %v2296_v50, %v1715_v51 }
  0x2b   :  { %976 = vmatpush.bf16.msra.mxu3 %v1734_v36  ;;  %1001 = vmatpush.bf16.msrb.mxu1 %v2074_v40  ;;  %v2378_v56 = vld [vmem:[#allocation8 + $0x330] sm:$0xf0]  ;;  %v1853_v59 = vld [vmem:[#allocation8 + $0x1b8] sm:$0xf]  ;;  %v2333_v60 = vld [vmem:[#allocation8 + $0x1c8] sm:$0xf0]  ;;  %v1694_v61 = vor.u32 %v2293_v54, %v1693_v53 }
  0x2c   :  { %v2291_v62 = vld [vmem:[#allocation8 + $0x7c] sm:$0xf]  ;;  %v1695_v63 = vld [vmem:[#allocation8 + $0x8c] sm:$0xf0]  ;;  %v2034_v0 = vor.u32 %v2378_v56, %v2033_v55  ;;  %v2288_v2 = vld [vmem:[#allocation8 + $0x60] sm:$0xf0]  ;;  %v1854_v5 = vor.u32 %v2333_v60, %v1853_v59 }
  0x2d   :  { %989 = vmatpush.bf16.msrb.mxu0 %v1894_v44  ;;  %v1673_v1 = vld [vmem:[#allocation8 + $0x50] sm:$0xf]  ;;  %v2013_v3 = vld [vmem:[#allocation8 + $0x2f8] sm:$0xf]  ;;  %v2373_v4 = vld [vmem:[#allocation8 + $0x308] sm:$0xf0]  ;;  %v1698_v6 = vor.u32 %v2291_v62, %v1695_v63 }
  0x2e   :  { %1015 = vmatpush.bf16.msrb.mxu2 %v1738_v45  ;;  %v1833_v7 = vld [vmem:[#allocation8 + $0x190] sm:$0xf]  ;;  %v2328_v8 = vld [vmem:[#allocation8 + $0x1a0] sm:$0xf0]  ;;  %v1674_v9 = vor.u32 %v2288_v2, %v1673_v1  ;;  %v2286_v10 = vld [vmem:[#allocation8 + $0x54] sm:$0xf]  ;;  %v2014_v12 = vor.u32 %v2373_v4, %v2013_v3 }
  0x2f   :  { %977 = vmatpush.bf16.msra.mxu3 %v1714_v49  ;;  %1002 = vmatpush.bf16.msrb.mxu1 %v2054_v52  ;;  %v1675_v11 = vld [vmem:[#allocation8 + $0x64] sm:$0xf0]  ;;  %v2283_v14 = vld [vmem:[#allocation8 + $0x38] sm:$0xf0]  ;;  %v1993_v15 = vld [vmem:[#allocation8 + $0x2d0] sm:$0xf]  ;;  %v1834_v17 = vor.u32 %v2328_v8, %v1833_v7 }
  0x30   :  { %v1653_v13 = vld [vmem:[#allocation8 + $0x28] sm:$0xf]  ;;  %v2368_v16 = vld [vmem:[#allocation8 + $0x2e0] sm:$0xf0]  ;;  %v1678_v18 = vor.u32 %v2286_v10, %v1675_v11  ;;  %v2323_v20 = vld [vmem:[#allocation8 + $0x178] sm:$0xf0] }
  0x31   :  { %990 = vmatpush.bf16.msrb.mxu0 %v1874_v57  ;;  %v1813_v19 = vld [vmem:[#allocation8 + $0x168] sm:$0xf]  ;;  %v1654_v21 = vor.u32 %v2283_v14, %v1653_v13  ;;  %v2281_v22 = vld [vmem:[#allocation8 + $0x2c] sm:$0xf]  ;;  %v1655_v23 = vld [vmem:[#allocation8 + $0x3c] sm:$0xf0]  ;;  %v1994_v24 = vor.u32 %v2368_v16, %v1993_v15 }
  0x32   :  { %1016 = vmatpush.bf16.msrb.mxu2 %v1718_v58  ;;  %v1633_v25 = vld [vmem:[#allocation8] sm:$0xf]  ;;  %v2278_v26 = vld [vmem:[#allocation8 + $0x10] sm:$0xf0]  ;;  %v1973_v27 = vld [vmem:[#allocation8 + $0x2a8] sm:$0xf]  ;;  %v1814_v31 = vor.u32 %v2323_v20, %v1813_v19  ;;  %v1658_v32 = vor.u32 %v2281_v22, %v1655_v23 }
  0x33   :  { %978 = vmatpush.bf16.msra.mxu3 %v1694_v61  ;;  %1003 = vmatpush.bf16.msrb.mxu1 %v2034_v0  ;;  %v2363_v28 = vld [vmem:[#allocation8 + $0x2b8] sm:$0xf0]  ;;  %v1935_v30 = vld [vmem:[#allocation8 + $0x26c] sm:$0xf0]  ;;  %v1793_v33 = vld [vmem:[#allocation8 + $0x140] sm:$0xf]  ;;  %v1634_v36 = vor.u32 %v2278_v26, %v1633_v25 }
  0x34   :  { %v2351_v29 = vld [vmem:[#allocation8 + $0x25c] sm:$0xf]  ;;  %v2318_v34 = vld [vmem:[#allocation8 + $0x150] sm:$0xf0]  ;;  %v2276_v35 = vld [vmem:[#allocation8 + $0x4] sm:$0xf]  ;;  %v1974_v40 = vor.u32 %v2363_v28, %v1973_v27 }
  0x35   :  { %991 = vmatpush.bf16.msrb.mxu0 %v1854_v5  ;;  %v1635_v37 = vld [vmem:[#allocation8 + $0x14] sm:$0xf0]  ;;  %v2391_v38 = vld [vmem:[#allocation8 + $0x39c] sm:$0xf]  ;;  %v2095_v39 = vld [vmem:[#allocation8 + $0x3ac] sm:$0xf0]  ;;  %v1938_v41 = vor.u32 %v2351_v29, %v1935_v30  ;;  %v1794_v48 = vor.u32 %v2318_v34, %v1793_v33 }
  0x36   :  { %1017 = vmatpush.bf16.msrb.mxu2 %v1698_v6  ;;  %v1941_v42 = vld [vmem:[#allocation8 + $0x260] sm:$0xf]  ;;  %v2354_v43 = vld [vmem:[#allocation8 + $0x270] sm:$0xf0]  ;;  %v1915_v45 = vld [vmem:[#allocation8 + $0x244] sm:$0xf0]  ;;  %v1638_v49 = vor.u32 %v2276_v35, %v1635_v37  ;;  %v2098_v52 = vor.u32 %v2391_v38, %v2095_v39 }
  0x37   :  { %979 = vmatpush.bf16.msra.mxu3 %v1674_v9  ;;  %1004 = vmatpush.bf16.msrb.mxu1 %v2014_v12  ;;  %v2346_v44 = vld [vmem:[#allocation8 + $0x234] sm:$0xf]  ;;  %v1953_v46 = vld [vmem:[#allocation8 + $0x280] sm:$0xf]  ;;  %v1942_v53 = vor.u32 %v2354_v43, %v1941_v42  ;;  %v2075_v56 = vld [vmem:[#allocation8 + $0x384] sm:$0xf0] }
  0x38   :  { %v2358_v47 = vld [vmem:[#allocation8 + $0x290] sm:$0xf0]  ;;  %v1781_v50 = vld [vmem:[#allocation8 + $0x120] sm:$0xf]  ;;  %v1918_v55 = vor.u32 %v2346_v44, %v1915_v45  ;;  %v1921_v58 = vld [vmem:[#allocation8 + $0x238] sm:$0xf] }
  0x39   :  { %992 = vmatpush.bf16.msrb.mxu0 %v1834_v17  ;;  %v2314_v51 = vld [vmem:[#allocation8 + $0x130] sm:$0xf0]  ;;  %v1954_v57 = vor.u32 %v2358_v47, %v1953_v46  ;;  %v2349_v59 = vld [vmem:[#allocation8 + $0x248] sm:$0xf0]  ;;  %v1895_v62 = vld [vmem:[#allocation8 + $0x21c] sm:$0xf0] }
  0x3a   :  { %1018 = vmatpush.bf16.msrb.mxu2 %v1678_v18  ;;  %v2386_v54 = vld [vmem:[#allocation8 + $0x374] sm:$0xf]  ;;  %v1782_v60 = vor.u32 %v2314_v51, %v1781_v50  ;;  %v2341_v61 = vld [vmem:[#allocation8 + $0x20c] sm:$0xf]  ;;  %v1761_v63 = vld [vmem:[#allocation8 + $0xf8] sm:$0xf]  ;;  %v1922_v2 = vor.u32 %v2349_v59, %v1921_v58 }
  0x3b   :  { %980 = vmatpush.bf16.msra.mxu3 %v1654_v21  ;;  %1005 = vmatpush.bf16.msrb.mxu1 %v1994_v24  ;;  %v2309_v0 = vld [vmem:[#allocation8 + $0x108] sm:$0xf0]  ;;  %v2078_v1 = vor.u32 %v2386_v54, %v2075_v56  ;;  %v2055_v4 = vld [vmem:[#allocation8 + $0x35c] sm:$0xf0]  ;;  %v1898_v5 = vor.u32 %v2341_v61, %v1895_v62  ;;  %v1901_v6 = vld [vmem:[#allocation8 + $0x210] sm:$0xf] }
  0x3c   :  { %v2381_v3 = vld [vmem:[#allocation8 + $0x34c] sm:$0xf]  ;;  %v2344_v7 = vld [vmem:[#allocation8 + $0x220] sm:$0xf0]  ;;  %v1762_v8 = vor.u32 %v2309_v0, %v1761_v63  ;;  %v1875_v10 = vld [vmem:[#allocation8 + $0x1f4] sm:$0xf0] }
  0x3d   :  { %993 = vmatpush.bf16.msrb.mxu0 %v1814_v31  ;;  %v2336_v9 = vld [vmem:[#allocation8 + $0x1e4] sm:$0xf]  ;;  %v1741_v11 = vld [vmem:[#allocation8 + $0xd0] sm:$0xf]  ;;  %v2058_v13 = vor.u32 %v2381_v3, %v2055_v4  ;;  %v1902_v14 = vor.u32 %v2344_v7, %v1901_v6  ;;  %v2035_v17 = vld [vmem:[#allocation8 + $0x334] sm:$0xf0] }
  0x3e   :  { %1019 = vmatpush.bf16.msrb.mxu2 %v1658_v32  ;;  %v2304_v12 = vld [vmem:[#allocation8 + $0xe0] sm:$0xf0]  ;;  %v1878_v16 = vor.u32 %v2336_v9, %v1875_v10  ;;  %v1881_v18 = vld [vmem:[#allocation8 + $0x1e8] sm:$0xf]  ;;  %v2339_v19 = vld [vmem:[#allocation8 + $0x1f8] sm:$0xf0] }
  0x3f   :  { %981 = vmatpush.bf16.msra.mxu3 %v1634_v36  ;;  %1006 = vmatpush.bf16.msrb.mxu1 %v1974_v40  ;;  %v2376_v15 = vld [vmem:[#allocation8 + $0x324] sm:$0xf]  ;;  %v1742_v20 = vor.u32 %v2304_v12, %v1741_v11  ;;  %v2331_v21 = vld [vmem:[#allocation8 + $0x1bc] sm:$0xf]  ;;  %v1855_v22 = vld [vmem:[#allocation8 + $0x1cc] sm:$0xf0]  ;;  %v1882_v26 = vor.u32 %v2339_v19, %v1881_v18 }
  0x40   :  { %v1721_v23 = vld [vmem:[#allocation8 + $0xa8] sm:$0xf]  ;;  %v2299_v24 = vld [vmem:[#allocation8 + $0xb8] sm:$0xf0]  ;;  %v2038_v25 = vor.u32 %v2376_v15, %v2035_v17  ;;  %v1858_v28 = vor.u32 %v2331_v21, %v1855_v22  ;;  %v2015_v29 = vld [vmem:[#allocation8 + $0x30c] sm:$0xf0] }
  0x41   :  { %994 = vmatpush.bf16.msrb.mxu0 %v1794_v48  ;;  %v2371_v27 = vld [vmem:[#allocation8 + $0x2fc] sm:$0xf]  ;;  %v1861_v30 = vld [vmem:[#allocation8 + $0x1c0] sm:$0xf]  ;;  %v2334_v31 = vld [vmem:[#allocation8 + $0x1d0] sm:$0xf0]  ;;  %v1722_v32 = vor.u32 %v2299_v24, %v1721_v23 }
  0x42   :  { %1020 = vmatpush.bf16.msrb.mxu2 %v1638_v49  ;;  %v2326_v33 = vld [vmem:[#allocation8 + $0x194] sm:$0xf]  ;;  %v1835_v34 = vld [vmem:[#allocation8 + $0x1a4] sm:$0xf0]  ;;  %v2018_v35 = vor.u32 %v2371_v27, %v2015_v29  ;;  %v1862_v36 = vor.u32 %v2334_v31, %v1861_v30  ;;  %v1841_v40 = vld [vmem:[#allocation8 + $0x198] sm:$0xf] }
  0x43   :  { %1026 = vmatpush.bf16.msrb.mxu3 %v1938_v41  ;;  %1007 = vmatpush.bf16.msrb.mxu1 %v1954_v57  ;;  %v2366_v37 = vld [vmem:[#allocation8 + $0x2d4] sm:$0xf]  ;;  %v1838_v38 = vor.u32 %v2326_v33, %v1835_v34  ;;  %v1995_v39 = vld [vmem:[#allocation8 + $0x2e4] sm:$0xf0]  ;;  %v2329_v41 = vld [vmem:[#allocation8 + $0x1a8] sm:$0xf0] }
  0x44   :  { %v1998_v42 = vor.u32 %v2366_v37, %v1995_v39  ;;  %v1842_v43 = vor.u32 %v2329_v41, %v1841_v40  ;;  %v1701_v44 = vld [vmem:[#allocation8 + $0x80] sm:$0xf]  ;;  %v2294_v45 = vld [vmem:[#allocation8 + $0x90] sm:$0xf0]  ;;  %v2321_v47 = vld [vmem:[#allocation8 + $0x16c] sm:$0xf] }
  0x45   :  { %1039 = vmatpush.bf16.msra.mxu0 %v2098_v52  ;;  %v1702_v46 = vor.u32 %v2294_v45, %v1701_v44  ;;  %v1815_v48 = vld [vmem:[#allocation8 + $0x17c] sm:$0xf0]  ;;  %v2361_v50 = vld [vmem:[#allocation8 + $0x2ac] sm:$0xf]  ;;  %v1821_v52 = vld [vmem:[#allocation8 + $0x170] sm:$0xf] }
  0x46   :  { %1065 = vmatpush.bf16.msra.mxu2 %v1942_v53  ;;  %v1818_v49 = vor.u32 %v2321_v47, %v1815_v48  ;;  %v1975_v51 = vld [vmem:[#allocation8 + $0x2bc] sm:$0xf0]  ;;  %v2324_v54 = vld [vmem:[#allocation8 + $0x180] sm:$0xf0]  ;;  %v2289_v56 = vld [vmem:[#allocation8 + $0x68] sm:$0xf0] }
  0x47   :  { %1027 = vmatpush.bf16.msrb.mxu3 %v1918_v55  ;;  %1052 = vmatpush.bf16.msra.mxu1 %v1782_v60  ;;  %v1978_v53 = vor.u32 %v2361_v50, %v1975_v51  ;;  %v1681_v55 = vld [vmem:[#allocation8 + $0x58] sm:$0xf]  ;;  %v1822_v57 = vor.u32 %v2324_v54, %v1821_v52  ;;  %v2316_v59 = vld [vmem:[#allocation8 + $0x144] sm:$0xf]  ;;  %v1801_v0 = vld [vmem:[#allocation8 + $0x148] sm:$0xf] }
  0x48   :  { %v1682_v58 = vor.u32 %v2289_v56, %v1681_v55  ;;  %v1795_v60 = vld [vmem:[#allocation8 + $0x154] sm:$0xf0]  ;;  %v2356_v61 = vld [vmem:[#allocation8 + $0x284] sm:$0xf]  ;;  %v1661_v4 = vld [vmem:[#allocation8 + $0x30] sm:$0xf] }
  0x49   :  { %1040 = vmatpush.bf16.msra.mxu0 %v2078_v1  ;;  %v1798_v62 = vor.u32 %v2316_v59, %v1795_v60  ;;  %v1955_v63 = vld [vmem:[#allocation8 + $0x294] sm:$0xf0]  ;;  %v2319_v1 = vld [vmem:[#allocation8 + $0x158] sm:$0xf0]  ;;  %v1641_v7 = vld [vmem:[#allocation8 + $0x8] sm:$0xf] }
  0x4a   :  { %1066 = vmatpush.bf16.msra.mxu2 %v1922_v2  ;;  %v1958_v2 = vor.u32 %v2356_v61, %v1955_v63  ;;  %v1802_v3 = vor.u32 %v2319_v1, %v1801_v0  ;;  %v121_v10 = vld [vmem:[#allocation7] sm:$0x7]  ;;  %v2394_v17 = vld [vmem:[#allocation8 + $0x3b0] sm:$0xf0]  ;;  %v2312_v18 = vld [vmem:[#allocation8 + $0x124] sm:$0xf] }
  0x4b   :  { %1028 = vmatpush.bf16.msrb.mxu3 %v1898_v5  ;;  %1053 = vmatpush.bf16.msra.mxu1 %v1762_v8  ;;  %v2284_v5 = vld [vmem:[#allocation8 + $0x40] sm:$0xf0]  ;;  %v2279_v8 = vld [vmem:[#allocation8 + $0x18] sm:$0xf0]  ;;  %v123_v11 = vperm.slane %v121_v10, 0  ;;  %v124_v12 = vperm.slane %v121_v10, 1 }
  0x4c   :  { %v1662_v6 = vor.u32 %v2284_v5, %v1661_v4  ;;  %v1642_v9 = vor.u32 %v2279_v8, %v1641_v7  ;;  %v2392_v21 = vld [vmem:[#allocation8 + $0x3a4] sm:$0xf]  ;;  %v2103_v22 = vld [vmem:[#allocation8 + $0x3b4] sm:$0xf0]  ;;  %v2389_v31 = vld [vmem:[#allocation8 + $0x388] sm:$0xf0] }
  0x4d   :  { %1041 = vmatpush.bf16.msra.mxu0 %v2058_v13  ;;  %v2106_v29 = vor.u32 %v2392_v21, %v2103_v22  ;;  %v2081_v30 = vld [vmem:[#allocation8 + $0x378] sm:$0xf]  ;;  %v1763_v34 = vld [vmem:[#allocation8 + $0x10c] sm:$0xf0]  ;;  %v2352_v41 = vld [vmem:[#allocation8 + $0x264] sm:$0xf] }
  0x4e   :  { %1067 = vmatpush.bf16.msra.mxu2 %v1902_v14  ;;  %v2082_v40 = vor.u32 %v2389_v31, %v2081_v30  ;;  %v2384_v47 = vld [vmem:[#allocation8 + $0x360] sm:$0xf0]  ;;  %v2302_v48 = vld [vmem:[#allocation8 + $0xd4] sm:$0xf]  ;;  %v2063_v52 = vld [vmem:[#allocation8 + $0x364] sm:$0xf0] }
  0x4f   :  { %1029 = vmatpush.bf16.msrb.mxu3 %v1878_v16  ;;  %1054 = vmatpush.bf16.msra.mxu1 %v1742_v20  ;;  %v2101_v16 = vld [vmem:[#allocation8 + $0x3a0] sm:$0xf]  ;;  %v1783_v20 = vld [vmem:[#allocation8 + $0x134] sm:$0xf0]  ;;  %v2382_v51 = vld [vmem:[#allocation8 + $0x354] sm:$0xf] }
  0x50   :  { %v2347_v56 = vld [vmem:[#allocation8 + $0x23c] sm:$0xf]  ;;  %v2066_v59 = vor.u32 %v2382_v51, %v2063_v52  ;;  %v2041_v60 = vld [vmem:[#allocation8 + $0x328] sm:$0xf]  ;;  %v1723_v63 = vld [vmem:[#allocation8 + $0xbc] sm:$0xf0] }
  0x51   :  { %1042 = vmatpush.bf16.msra.mxu0 %v2038_v25  ;;  %v125_v25 = vperm.slane %v121_v10, 2  ;;  %v2379_v61 = vld [vmem:[#allocation8 + $0x338] sm:$0xf0]  ;;  %v2377_v0 = vld [vmem:[#allocation8 + $0x32c] sm:$0xf] }
  0x52   :  { %1068 = vmatpush.bf16.msra.mxu2 %v1882_v26  ;;  %v2102_v26 = vor.u32 %v2394_v17, %v2101_v16  ;;  %v2043_v1 = vld [vmem:[#allocation8 + $0x33c] sm:$0xf0]  ;;  %v2042_v4 = vor.u32 %v2379_v61, %v2041_v60  ;;  %v2342_v5 = vld [vmem:[#allocation8 + $0x214] sm:$0xf]  ;;  %v2337_v16 = vld [vmem:[#allocation8 + $0x1ec] sm:$0xf] }
  0x53   :  { %1030 = vmatpush.bf16.msrb.mxu3 %v1858_v28  ;;  %1055 = vmatpush.bf16.msra.mxu1 %v1722_v32  ;;  %v1786_v28 = vor.u32 %v2312_v18, %v1783_v20  ;;  %v2307_v32 = vld [vmem:[#allocation8 + $0xfc] sm:$0xf]  ;;  %v2046_v8 = vor.u32 %v2377_v0, %v2043_v1  ;;  %v2374_v10 = vld [vmem:[#allocation8 + $0x310] sm:$0xf0]  ;;  %v1883_v17 = vld [vmem:[#allocation8 + $0x1fc] sm:$0xf0] }
  0x54   :  { %v1766_v45 = vor.u32 %v2307_v32, %v1763_v34  ;;  %v2001_v20 = vld [vmem:[#allocation8 + $0x2d8] sm:$0xf]  ;;  %v2369_v22 = vld [vmem:[#allocation8 + $0x2e8] sm:$0xf0]  ;;  %v1981_v34 = vld [vmem:[#allocation8 + $0x2b0] sm:$0xf] }
  0x55   :  { %1043 = vmatpush.bf16.msra.mxu0 %v2018_v35  ;;  %v2387_v35 = vld [vmem:[#allocation8 + $0x37c] sm:$0xf]  ;;  %v1863_v30 = vld [vmem:[#allocation8 + $0x1d4] sm:$0xf0]  ;;  %v2002_v31 = vor.u32 %v2369_v22, %v2001_v20  ;;  %v2357_v51 = vld [vmem:[#allocation8 + $0x28c] sm:$0xf] }
  0x56   :  { %1069 = vmatpush.bf16.msra.mxu2 %v1862_v36  ;;  %v2083_v36 = vld [vmem:[#allocation8 + $0x38c] sm:$0xf0]  ;;  %v1963_v52 = vld [vmem:[#allocation8 + $0x29c] sm:$0xf0]  ;;  %v1823_v60 = vld [vmem:[#allocation8 + $0x184] sm:$0xf0] }
  0x57   :  { %1031 = vmatpush.bf16.msrb.mxu3 %v1838_v38  ;;  %1056 = vmatpush.bf16.msra.mxu1 %v1702_v46  ;;  %v2086_v46 = vor.u32 %v2387_v35, %v2083_v36  ;;  %v2364_v36 = vld [vmem:[#allocation8 + $0x2c0] sm:$0xf0]  ;;  %v2390_v20 = vld [vmem:[#allocation8 + $0x390] sm:$0xf0] }
  0x59   :  { %1044 = vmatpush.bf16.msra.mxu0 %v1998_v42  ;;  %v1943_v42 = vld [vmem:[#allocation8 + $0x274] sm:$0xf0] }
  0x5a   :  { %1070 = vmatpush.bf16.msra.mxu2 %v1842_v43  ;;  %v2061_v43 = vld [vmem:[#allocation8 + $0x350] sm:$0xf] }
  0x5b   :  { %1032 = vmatpush.bf16.msrb.mxu3 %v1818_v49  ;;  %1057 = vmatpush.bf16.msra.mxu1 %v1682_v58  ;;  %v1743_v49 = vld [vmem:[#allocation8 + $0xe4] sm:$0xf0]  ;;  %v2062_v55 = vor.u32 %v2384_v47, %v2061_v43  ;;  %v1843_v43 = vld [vmem:[#allocation8 + $0x1ac] sm:$0xf0]  ;;  %v2359_v47 = vld [vmem:[#allocation8 + $0x298] sm:$0xf0] }
  0x5c   :  { %v1746_v58 = vor.u32 %v2302_v48, %v1743_v49  ;;  %v2277_v48 = vld [vmem:[#allocation8 + $0xc] sm:$0xf] }
  0x5d   :  { %1045 = vmatpush.bf16.msra.mxu0 %v1978_v53  ;;  %v1946_v53 = vor.u32 %v2352_v41, %v1943_v42  ;;  %v1983_v41 = vld [vmem:[#allocation8 + $0x2c4] sm:$0xf0]  ;;  %v2327_v42 = vld [vmem:[#allocation8 + $0x19c] sm:$0xf] }
  0x5e   :  { %1071 = vmatpush.bf16.msra.mxu2 %v1822_v57  ;;  %v1923_v57 = vld [vmem:[#allocation8 + $0x24c] sm:$0xf0] }
  0x5f   :  { %1033 = vmatpush.bf16.msrb.mxu3 %v1798_v62  ;;  %1058 = vmatpush.bf16.msra.mxu1 %v1662_v6  ;;  %v2297_v62 = vld [vmem:[#allocation8 + $0xac] sm:$0xf]  ;;  %v1903_v6 = vld [vmem:[#allocation8 + $0x224] sm:$0xf0] }
  0x60   :  { %v1726_v7 = vor.u32 %v2297_v62, %v1723_v63  ;;  %v1966_v63 = vor.u32 %v2357_v51, %v1963_v52  ;;  %v2029_v51 = vld [vmem:[#allocation8 + $0x308] sm:$0xf]  ;;  %v2375_v52 = vld [vmem:[#allocation8 + $0x318] sm:$0xf0] }
  0x61   :  { %1046 = vmatpush.bf16.msra.mxu0 %v1958_v2 }
  0x62   :  { %1072 = vmatpush.bf16.msra.mxu2 %v1802_v3  ;;  %v1926_v3 = vor.u32 %v2347_v56, %v1923_v57  ;;  %v2315_v56 = vld [vmem:[#allocation8 + $0x138] sm:$0xf0]  ;;  %v1949_v57 = vld [vmem:[#allocation8 + $0x268] sm:$0xf] }
  0x63   :  { %1059 = vmatpush.bf16.msra.mxu1 %v1642_v9  ;;  %v2021_v9 = vld [vmem:[#allocation8 + $0x300] sm:$0xf] }
  0x64   :  { %v2022_v18 = vor.u32 %v2374_v10, %v2021_v9  ;;  %v2109_v9 = vld [vmem:[#allocation8 + $0x3a8] sm:$0xf]  ;;  %v2395_v10 = vld [vmem:[#allocation8 + $0x3b8] sm:$0xf0] }
  0xa1   :  { %v158_v13 = vpop.f32.mrf.mxu0  ;;  %v171_v15 = vpop.f32.mrf.mxu1 }
  0xa2   :  { %v159_v14 = vadd.f32 %v158_v13, %v123_v11  ;;  %v172_v19 = vadd.f32 %v171_v15, %v124_v12  ;;  %v2292_v11 = vld [vmem:[#allocation8 + $0x84] sm:$0xf]  ;;  %v1703_v12 = vld [vmem:[#allocation8 + $0x94] sm:$0xf0]  ;;  %v1906_v13 = vor.u32 %v2342_v5, %v1903_v6  ;;  %v1929_v5 = vld [vmem:[#allocation8 + $0x240] sm:$0xf] }
  0xa3   :  { %v2023_v15 = vld [vmem:[#allocation8 + $0x314] sm:$0xf0]  ;;  %v2350_v6 = vld [vmem:[#allocation8 + $0x250] sm:$0xf0] }
  0xa4   :  { %v188_v23 = vmax.f32 %v159_v14, 0.0  ;;  %v189_v24 = vmax.f32 %v172_v19, 0.0  ;;  %v2372_v14 = vld [vmem:[#allocation8 + $0x304] sm:$0xf]  ;;  %v1706_v19 = vor.u32 %v2292_v11, %v1703_v12  ;;  %v1930_v12 = vor.u32 %v2350_v6, %v1929_v5  ;;  %v1809_v5 = vld [vmem:[#allocation8 + $0x150] sm:$0xf] }
  0xa5   :  { %v2026_v21 = vor.u32 %v2372_v14, %v2023_v15  ;;  %v1749_v14 = vld [vmem:[#allocation8 + $0xd8] sm:$0xf]  ;;  %v2305_v15 = vld [vmem:[#allocation8 + $0xe8] sm:$0xf0]  ;;  %v2320_v6 = vld [vmem:[#allocation8 + $0x160] sm:$0xf0] }
  0xa6   :  { %v2706_v27 = vpack.c.bf16 %v188_v23, %v188_v23  ;;  %v2708_v33 = vpack.c.bf16 %v189_v24, %v189_v24  ;;  %v2287_v23 = vld [vmem:[#allocation8 + $0x5c] sm:$0xf]  ;;  %v1683_v24 = vld [vmem:[#allocation8 + $0x6c] sm:$0xf0] }
  0xa7   :  { %v1686_v32 = vor.u32 %v2287_v23, %v1683_v24  ;;  %v1729_v23 = vld [vmem:[#allocation8 + $0xb0] sm:$0xf]  ;;  %v2300_v24 = vld [vmem:[#allocation8 + $0xc0] sm:$0xf0] }
  0xa8   :  { %v184_v37 = vpop.f32.mrf.mxu2  ;;  %982 = vmatmul.bf16.vlgmr.msra.gmra.mxu3 %v2706_v27  ;;  %1021 = vmatmul.bf16.vlgmr.msrb.gmra.mxu2 %v2706_v27 }
  0xa9   :  { %v185_v38 = vadd.f32 %v184_v37, %v125_v25  ;;  %995 = vmatmul.bf16.vlgmr.msrb.gmra.mxu0 %v2708_v33  ;;  %1078 = vmatpush.bf16.msra.mxu3 %v2102_v26  ;;  %v160_v39 = vpop.f32.mrf.mxu0  ;;  %v173_v44 = vpop.f32.mrf.mxu1  ;;  %v1886_v25 = vor.u32 %v2337_v16, %v1883_v17  ;;  %v2367_v26 = vld [vmem:[#allocation8 + $0x2dc] sm:$0xf]  ;;  %v2282_v37 = vld [vmem:[#allocation8 + $0x34] sm:$0xf]  ;;  %v2110_v16 = vor.u32 %v2395_v10, %v2109_v9  ;;  %v1909_v17 = vld [vmem:[#allocation8 + $0x218] sm:$0xf] }
  0xaa   :  { %1091 = vmatpush.bf16.msrb.mxu0 %v1786_v28  ;;  %1117 = vmatpush.bf16.msrb.mxu2 %v2106_v29  ;;  %v2003_v28 = vld [vmem:[#allocation8 + $0x2ec] sm:$0xf0]  ;;  %v2332_v29 = vld [vmem:[#allocation8 + $0x1c4] sm:$0xf]  ;;  %v1982_v44 = vor.u32 %v2364_v36, %v1981_v34  ;;  %v1730_v34 = vor.u32 %v2300_v24, %v1729_v23  ;;  %v1709_v36 = vld [vmem:[#allocation8 + $0x88] sm:$0xf]  ;;  %v1810_v10 = vor.u32 %v2320_v6, %v1809_v5 }
  0xab   :  { %v190_v50 = vmax.f32 %v185_v38, 0.0  ;;  %v2006_v35 = vor.u32 %v2367_v26, %v2003_v28  ;;  %v1663_v38 = vld [vmem:[#allocation8 + $0x44] sm:$0xf0]  ;;  %v1866_v39 = vor.u32 %v2332_v29, %v1863_v30  ;;  %v1889_v28 = vld [vmem:[#allocation8 + $0x1f0] sm:$0xf]  ;;  %v2418_v23 = vld [vmem:[#allocation11 + $0xb0] sm:$0xff] }
  0xac   :  { %v2340_v29 = vld [vmem:[#allocation8 + $0x200] sm:$0xf0]  ;;  %v2069_v30 = vld [vmem:[#allocation8 + $0x358] sm:$0xf] }
  0xad   :  { %v2713_v54 = vpack.c.bf16 %v190_v50, %v190_v50  ;;  %1079 = vmatpush.bf16.msra.mxu3 %v2082_v40  ;;  %v2362_v40 = vld [vmem:[#allocation8 + $0x2b4] sm:$0xf]  ;;  %v1643_v50 = vld [vmem:[#allocation8 + $0x1c] sm:$0xf0]  ;;  %v2432_v6 = vld [vmem:[#allocation11 + $0x120] sm:$0xff] }
  0xae   :  { %1092 = vmatpush.bf16.msrb.mxu0 %v1766_v45  ;;  %1118 = vmatpush.bf16.msrb.mxu2 %v2086_v46  ;;  %v1666_v45 = vor.u32 %v2282_v37, %v1663_v38  ;;  %v1961_v46 = vld [vmem:[#allocation8 + $0x288] sm:$0xf]  ;;  %v1986_v49 = vor.u32 %v2362_v40, %v1983_v41  ;;  %v1646_v62 = vor.u32 %v2277_v48, %v1643_v50  ;;  %v2295_v37 = vld [vmem:[#allocation8 + $0x98] sm:$0xf0]  ;;  %v2049_v41 = vld [vmem:[#allocation8 + $0x330] sm:$0xf] }
  0xaf   :  { %1008 = vmatmul.bf16.vlgmr.msrb.gmra.mxu1 %v2713_v54  ;;  %v1962_v61 = vor.u32 %v2359_v47, %v1961_v46  ;;  %v2335_v40 = vld [vmem:[#allocation8 + $0x1d8] sm:$0xf0]  ;;  %v1689_v46 = vld [vmem:[#allocation8 + $0x60] sm:$0xf]  ;;  %v2290_v47 = vld [vmem:[#allocation8 + $0x70] sm:$0xf0] }
  0xb0   :  { %1104 = vmatpush.bf16.msrb.mxu1 %v1946_v53  ;;  %v186_v2 = vpop.f32.mrf.mxu2  ;;  %v1846_v53 = vor.u32 %v2327_v42, %v1843_v43  ;;  %v2380_v42 = vld [vmem:[#allocation8 + $0x340] sm:$0xf0]  ;;  %v2401_v43 = vld [vmem:[#allocation11 + $0x28] sm:$0xff]  ;;  %v2406_v24 = vld [vmem:[#allocation11 + $0x50] sm:$0xff] }
  0xb1   :  { %1080 = vmatpush.bf16.msra.mxu3 %v2062_v55  ;;  %v1789_v55 = vld [vmem:[#allocation8 + $0x128] sm:$0xf]  ;;  %v2050_v48 = vor.u32 %v2380_v42, %v2049_v41  ;;  %v2330_v50 = vld [vmem:[#allocation8 + $0x1b0] sm:$0xf0] }
  0xb2   :  { %1093 = vmatpush.bf16.msrb.mxu0 %v1746_v58  ;;  %1119 = vmatpush.bf16.msrb.mxu2 %v2066_v59  ;;  %v2355_v58 = vld [vmem:[#allocation8 + $0x278] sm:$0xf0]  ;;  %v2322_v59 = vld [vmem:[#allocation8 + $0x174] sm:$0xf]  ;;  %v1790_v0 = vor.u32 %v2315_v56, %v1789_v55  ;;  %v1690_v55 = vor.u32 %v2290_v47, %v1689_v46 }
  0xb3   :  { %v1950_v1 = vor.u32 %v2355_v58, %v1949_v57  ;;  %v1826_v2 = vor.u32 %v2322_v59, %v1823_v60  ;;  %v1669_v57 = vld [vmem:[#allocation8 + $0x38] sm:$0xf]  ;;  %v2285_v58 = vld [vmem:[#allocation8 + $0x48] sm:$0xf0]  ;;  %v2030_v59 = vor.u32 %v2375_v52, %v2029_v51 }
  0xb4   :  { %1105 = vmatpush.bf16.msrb.mxu1 %v1926_v3  ;;  %v1769_v3 = vld [vmem:[#allocation8 + $0x100] sm:$0xf]  ;;  %v1829_v60 = vld [vmem:[#allocation8 + $0x178] sm:$0xf]  ;;  %v2420_v52 = vld [vmem:[#allocation11 + $0xc0] sm:$0xff] }
  0xb5   :  { %1081 = vmatpush.bf16.msra.mxu3 %v2042_v4  ;;  %v2310_v4 = vld [vmem:[#allocation8 + $0x110] sm:$0xf0] }
  0xb6   :  { %1094 = vmatpush.bf16.msrb.mxu0 %v1726_v7  ;;  %1120 = vmatpush.bf16.msrb.mxu2 %v2046_v8  ;;  %v2317_v7 = vld [vmem:[#allocation8 + $0x14c] sm:$0xf]  ;;  %v1803_v8 = vld [vmem:[#allocation8 + $0x15c] sm:$0xf0]  ;;  %v1770_v11 = vor.u32 %v2310_v4, %v1769_v3  ;;  %v2280_v3 = vld [vmem:[#allocation8 + $0x20] sm:$0xf0] }
  0xb8   :  { %1106 = vmatpush.bf16.msrb.mxu1 %v1906_v13  ;;  %1034 = vmatmul.bf16.vlgmr.msrb.gmra.mxu3 %v2708_v33  ;;  %v1806_v13 = vor.u32 %v2317_v7, %v1803_v8  ;;  %v1989_v7 = vld [vmem:[#allocation8 + $0x2b8] sm:$0xf]  ;;  %v2365_v8 = vld [vmem:[#allocation8 + $0x2c8] sm:$0xf0] }
  0xb9   :  { %1047 = vmatmul.bf16.vlgmr.msra.gmra.mxu0 %v2713_v54  ;;  %1073 = vmatmul.bf16.vlgmr.msra.gmra.mxu2 %v2708_v33 }
  0xba   :  { %1082 = vmatpush.bf16.msra.mxu3 %v2022_v18  ;;  %1095 = vmatpush.bf16.msrb.mxu0 %v1706_v19  ;;  %v2345_v18 = vld [vmem:[#allocation8 + $0x228] sm:$0xf0]  ;;  %v2089_v19 = vld [vmem:[#allocation8 + $0x380] sm:$0xf] }
  0xbb   :  { %1121 = vmatpush.bf16.msrb.mxu2 %v2026_v21  ;;  %v1750_v21 = vor.u32 %v2305_v15, %v1749_v14  ;;  %v1910_v22 = vor.u32 %v2345_v18, %v1909_v17  ;;  %v2090_v26 = vor.u32 %v2390_v20, %v2089_v19  ;;  %v2411_v15 = vld [vmem:[#allocation11 + $0x78] sm:$0xff]  ;;  %v2410_v17 = vld [vmem:[#allocation11 + $0x70] sm:$0xff]  ;;  %v2409_v19 = vld [vmem:[#allocation11 + $0x68] sm:$0xff] }
  0xbc   :  { %1107 = vmatpush.bf16.msrb.mxu1 %v1886_v25  ;;  %v2403_v25 = vld [vmem:[#allocation11 + $0x38] sm:$0xff]  ;;  %v2398_v18 = vld [vmem:[#allocation11 + $0x10] sm:$0xff]  ;;  %v2397_v20 = vld [vmem:[#allocation11 + $0x8] sm:$0xff] }
  0xbe   :  { %1083 = vmatpush.bf16.msra.mxu3 %v2002_v31  ;;  %1096 = vmatpush.bf16.msrb.mxu0 %v1686_v32  ;;  %v2385_v31 = vld [vmem:[#allocation8 + $0x368] sm:$0xf0]  ;;  %v2402_v32 = vld [vmem:[#allocation11 + $0x30] sm:$0xff] }
  0xbf   :  { %1122 = vmatpush.bf16.msrb.mxu2 %v2006_v35  ;;  %1060 = vmatmul.bf16.vlgmr.msra.gmra.mxu1 %v2706_v27  ;;  %v1890_v35 = vor.u32 %v2340_v29, %v1889_v28  ;;  %v2070_v38 = vor.u32 %v2385_v31, %v2069_v30  ;;  %v2405_v28 = vld [vmem:[#allocation11 + $0x48] sm:$0xff]  ;;  %v2416_v30 = vld [vmem:[#allocation11 + $0xa0] sm:$0xff] }
  0xc0   :  { %1108 = vmatpush.bf16.msrb.mxu1 %v1866_v39  ;;  %v1869_v39 = vld [vmem:[#allocation8 + $0x1c8] sm:$0xf]  ;;  %v2425_v29 = vld [vmem:[#allocation11 + $0xe8] sm:$0xff] }
  0xc1   :  { %v2404_v31 = vld [vmem:[#allocation11 + $0x40] sm:$0xff] }
  0xc2   :  { %1084 = vmatpush.bf16.msra.mxu3 %v1982_v44  ;;  %1097 = vmatpush.bf16.msrb.mxu0 %v1666_v45  ;;  %v1710_v44 = vor.u32 %v2295_v37, %v1709_v36  ;;  %v1870_v45 = vor.u32 %v2335_v40, %v1869_v39  ;;  %v2423_v37 = vld [vmem:[#allocation11 + $0xd8] sm:$0xff]  ;;  %v2422_v40 = vld [vmem:[#allocation11 + $0xd0] sm:$0xff] }
  0xc3   :  { %1123 = vmatpush.bf16.msrb.mxu2 %v1986_v49  ;;  %v1849_v49 = vld [vmem:[#allocation8 + $0x1a0] sm:$0xf] }
  0xc4   :  { %1109 = vmatpush.bf16.msrb.mxu1 %v1846_v53  ;;  %v2400_v53 = vld [vmem:[#allocation11 + $0x20] sm:$0xff]  ;;  %v1850_v56 = vor.u32 %v2330_v50, %v1849_v49 }
  0xc5   :  { %v2412_v50 = vld [vmem:[#allocation11 + $0x80] sm:$0xff] }
  0xc6   :  { %1085 = vmatpush.bf16.msra.mxu3 %v1962_v61  ;;  %1098 = vmatpush.bf16.msrb.mxu0 %v1646_v62  ;;  %v2325_v61 = vld [vmem:[#allocation8 + $0x188] sm:$0xf0]  ;;  %v2009_v62 = vld [vmem:[#allocation8 + $0x2e0] sm:$0xf] }
  0xc7   :  { %1124 = vmatpush.bf16.msrb.mxu2 %v1966_v63  ;;  %v2370_v63 = vld [vmem:[#allocation8 + $0x2f0] sm:$0xf0] }
  0xc8   :  { %1110 = vmatpush.bf16.msrb.mxu1 %v1826_v2  ;;  %v1649_v2 = vld [vmem:[#allocation8 + $0x10] sm:$0xf]  ;;  %v2010_v4 = vor.u32 %v2370_v63, %v2009_v62 }
  0xc9   :  { %1086 = vmatmul.bf16.vlgmr.msra.gmra.mxu3 %v2713_v54  ;;  %1099 = vmatmul.bf16.vlgmr.msrb.gmra.mxu0 %v2706_v27  ;;  %v1650_v9 = vor.u32 %v2280_v3, %v1649_v2 }
  0xca   :  { %1130 = vmatpush.bf16.msrb.mxu3 %v1790_v0  ;;  %1143 = vmatpush.bf16.msra.mxu0 %v1950_v1  ;;  %v1670_v0 = vor.u32 %v2285_v58, %v1669_v57  ;;  %v1830_v1 = vor.u32 %v2325_v61, %v1829_v60  ;;  %v2435_v58 = vld [vmem:[#allocation11 + $0x138] sm:$0xff]  ;;  %v2434_v61 = vld [vmem:[#allocation11 + $0x130] sm:$0xff] }
  0xcb   :  { %1125 = vmatmul.bf16.vlgmr.msrb.gmra.mxu2 %v2713_v54 }
  0xcc   :  { %1111 = vmatpush.bf16.msrb.mxu1 %v1806_v13  ;;  %1503 = vmatpush.bf16.msra.mxu2 %v2403_v25  ;;  %v2360_v13 = vld [vmem:[#allocation8 + $0x2a0] sm:$0xf0]  ;;  %v2426_v25 = vld [vmem:[#allocation11 + $0xf0] sm:$0xff] }
  0xce   :  { %1131 = vmatpush.bf16.msrb.mxu3 %v1770_v11  ;;  %1144 = vmatpush.bf16.msra.mxu0 %v1930_v12  ;;  %v1990_v11 = vor.u32 %v2365_v8, %v1989_v7  ;;  %v1969_v12 = vld [vmem:[#allocation8 + $0x290] sm:$0xf] }
  0xcf   :  { %1112 = vmatmul.bf16.vlgmr.msrb.gmra.mxu1 %v2708_v33  ;;  %v1970_v14 = vor.u32 %v2360_v13, %v1969_v12  ;;  %v2431_v13 = vld [vmem:[#allocation11 + $0x118] sm:$0xff] }
  0xd0   :  { %1156 = vmatpush.bf16.msra.mxu1 %v2110_v16  ;;  %1504 = vmatpush.bf16.msra.mxu2 %v2402_v32  ;;  %v2399_v16 = vld [vmem:[#allocation11 + $0x18] sm:$0xff]  ;;  %v2424_v32 = vld [vmem:[#allocation11 + $0xe0] sm:$0xff] }
  0xd2   :  { %1132 = vmatpush.bf16.msrb.mxu3 %v1750_v21  ;;  %1145 = vmatpush.bf16.msra.mxu0 %v1910_v22  ;;  %v2408_v21 = vld [vmem:[#allocation11 + $0x60] sm:$0xff]  ;;  %v2419_v22 = vld [vmem:[#allocation11 + $0xb8] sm:$0xff] }
  0xd4   :  { %1157 = vmatpush.bf16.msra.mxu1 %v2090_v26  ;;  %1505 = vmatpush.bf16.msra.mxu2 %v2401_v43  ;;  %v2417_v26 = vld [vmem:[#allocation11 + $0xa8] sm:$0xff] }
  0xd6   :  { %1133 = vmatpush.bf16.msrb.mxu3 %v1730_v34  ;;  %1146 = vmatpush.bf16.msra.mxu0 %v1890_v35  ;;  %v2415_v34 = vld [vmem:[#allocation11 + $0x98] sm:$0xff] }
  0xd7   :  { %v2727_v35 = vld [vmem:[#allocation10] sm:$0x1f] }
  0xd8   :  { %1158 = vmatpush.bf16.msra.mxu1 %v2070_v38  ;;  %1506 = vmatpush.bf16.msra.mxu2 %v2400_v53  ;;  %v2414_v38 = vld [vmem:[#allocation11 + $0x90] sm:$0xff]  ;;  %v340_v39 = vperm.slane %v2727_v35, 0 }
  0xda   :  { %1134 = vmatpush.bf16.msrb.mxu3 %v1710_v44  ;;  %1147 = vmatpush.bf16.msra.mxu0 %v1870_v45  ;;  %v2413_v45 = vld [vmem:[#allocation11 + $0x88] sm:$0xff] }
  0xdc   :  { %1159 = vmatpush.bf16.msra.mxu1 %v2050_v48  ;;  %1507 = vmatpush.bf16.msra.mxu2 %v2399_v16  ;;  %v2421_v48 = vld [vmem:[#allocation11 + $0xc8] sm:$0xff]  ;;  %v343_v16 = vperm.slane %v2727_v35, 3 }
  0xde   :  { %1135 = vmatpush.bf16.msrb.mxu3 %v1690_v55  ;;  %1148 = vmatpush.bf16.msra.mxu0 %v1850_v56 }
  0xe0   :  { %1160 = vmatpush.bf16.msra.mxu1 %v2030_v59  ;;  %1508 = vmatpush.bf16.msra.mxu2 %v2398_v18  ;;  %v341_v59 = vperm.slane %v2727_v35, 1 }
  0xe2   :  { %1136 = vmatpush.bf16.msrb.mxu3 %v1670_v0  ;;  %1149 = vmatpush.bf16.msra.mxu0 %v1830_v1  ;;  %v2433_v0 = vld [vmem:[#allocation11 + $0x128] sm:$0xff] }
  0xe4   :  { %1161 = vmatpush.bf16.msra.mxu1 %v2010_v4  ;;  %1509 = vmatpush.bf16.msra.mxu2 %v2397_v20 }
  0xe6   :  { %1137 = vmatpush.bf16.msrb.mxu3 %v1650_v9  ;;  %1150 = vmatpush.bf16.msra.mxu0 %v1810_v10  ;;  %v342_v9 = vperm.slane %v2727_v35, 2 }
  0xe8   :  { %1162 = vmatpush.bf16.msra.mxu1 %v1990_v11 }
  0xe9   :  { %1138 = vmatmul.bf16.vlgmr.msrb.gmra.mxu3 %v2706_v27  ;;  %1151 = vmatmul.bf16.vlgmr.msra.gmra.mxu0 %v2708_v33  ;;  %v2396_v27 = vld [vmem:[#allocation11] sm:$0xff]  ;;  %v2407_v33 = vld [vmem:[#allocation11 + $0x58] sm:$0xff] }
  0xea   :  { %1516 = vmatpush.bf16.msra.mxu3 %v2411_v15  ;;  %1510 = vmatpush.bf16.msra.mxu2 %v2396_v27  ;;  %v2429_v27 = vld [vmem:[#allocation11 + $0x108] sm:$0xff] }
  0xeb   :  { %1529 = vmatpush.bf16.msrb.mxu0 %v2419_v22 }
  0xec   :  { %1163 = vmatpush.bf16.msra.mxu1 %v1970_v14 }
  0xee   :  { %1517 = vmatpush.bf16.msra.mxu3 %v2410_v17  ;;  %1555 = vmatpush.bf16.msrb.mxu2 %v2435_v58  ;;  %v2430_v17 = vld [vmem:[#allocation11 + $0x110] sm:$0xff] }
  0xef   :  { %1164 = vmatmul.bf16.vlgmr.msra.gmra.mxu1 %v2713_v54  ;;  %v2427_v54 = vld [vmem:[#allocation11 + $0xf8] sm:$0xff]  ;;  %1530 = vmatpush.bf16.msrb.mxu0 %v2418_v23 }
  0xf0   :  { %1542 = vmatpush.bf16.msrb.mxu1 %v2427_v54 }
  0xf2   :  { %1518 = vmatpush.bf16.msra.mxu3 %v2409_v19  ;;  %1556 = vmatpush.bf16.msrb.mxu2 %v2434_v61 }
  0xf3   :  { %1531 = vmatpush.bf16.msrb.mxu0 %v2417_v26  ;;  %v2428_v26 = vld [vmem:[#allocation11 + $0x100] sm:$0xff] }
  0xf4   :  { %1543 = vmatpush.bf16.msrb.mxu1 %v2426_v25 }
  0xf6   :  { %1519 = vmatpush.bf16.msra.mxu3 %v2408_v21  ;;  %1557 = vmatpush.bf16.msrb.mxu2 %v2433_v0 }
  0xf7   :  { %1532 = vmatpush.bf16.msrb.mxu0 %v2416_v30 }
  0xf8   :  { %1544 = vmatpush.bf16.msrb.mxu1 %v2425_v29 }
  0xfa   :  { %1520 = vmatpush.bf16.msra.mxu3 %v2407_v33  ;;  %1558 = vmatpush.bf16.msrb.mxu2 %v2432_v6 }
  0xfb   :  { %1533 = vmatpush.bf16.msrb.mxu0 %v2415_v34 }
  0xfc   :  { %1545 = vmatpush.bf16.msrb.mxu1 %v2424_v32 }
  0xfe   :  { %1521 = vmatpush.bf16.msra.mxu3 %v2406_v24  ;;  %1559 = vmatpush.bf16.msrb.mxu2 %v2431_v13 }
  0xff   :  { %1534 = vmatpush.bf16.msrb.mxu0 %v2414_v38 }
 0x100   :  { %1546 = vmatpush.bf16.msrb.mxu1 %v2423_v37  ;;  %v344_v37 = vperm.slane %v2727_v35, 4  ;;  %v2449_v35 = vld [vmem:[%s2748_s6] ss:$0 sm:$0xff]  ;;  %s2644_s6 = smov [#allocation13]  }
 0x101   :  { %s1601_s10 = sshll.u32 %s2644_s6, 4  ;;  %s1602_s10 = int_to_ptr.vmem [resolvable:$true] %s1601_s10 }
 0x102   :  { %1522 = vmatpush.bf16.msra.mxu3 %v2405_v28  ;;  %1560 = vmatpush.bf16.msrb.mxu2 %v2430_v17 }
 0x103   :  { %1535 = vmatpush.bf16.msrb.mxu0 %v2413_v45 }
 0x104   :  { %1547 = vmatpush.bf16.msrb.mxu1 %v2422_v40 }
 0x106   :  { %1523 = vmatpush.bf16.msra.mxu3 %v2404_v31  ;;  %1561 = vmatpush.bf16.msrb.mxu2 %v2429_v27 }
 0x107   :  { %1536 = vmatpush.bf16.msrb.mxu0 %v2412_v50 }
 0x108   :  { %1548 = vmatpush.bf16.msrb.mxu1 %v2421_v48 }
 0x10a   :  { %1562 = vmatpush.bf16.msrb.mxu2 %v2428_v26 }
 0x10c   :  { %1549 = vmatpush.bf16.msrb.mxu1 %v2420_v52 }
 0x126   :  { %v996_v36 = vpop.f32.mrf.mxu0 }
 0x12b   :  { %v983_v41 = vpop.f32.mrf.mxu3  ;;  %v1022_v42 = vpop.f32.mrf.mxu2 }
 0x12c   :  { %v984_v43 = vadd.f32 %v983_v41, %v340_v39  ;;  %v1009_v44 = vpop.f32.mrf.mxu1  ;;  %v1023_v62 = vadd.f32 %v1022_v42, %v341_v59  ;;  %v1568_v59 = vlaneseq }
 0x12e   :  { %v997_v46 = vadd.f32 %v996_v36, %v984_v43  ;;  %v998_v47 = vpop.f32.mrf.mxu0  ;;  %v1569_v61 = vand.u32 127, %v1568_v59 }
 0x130   :  { %v1010_v49 = vadd.f32 %v1009_v44, %v997_v46  ;;  %vm1570_vm1 = vcmp.eq.s32.totalorder %v1569_v61, 0 }
 0x132   :  { %v1169_v51 = vmax.f32 %v1010_v49, 0.0 }
 0x133   :  { %v985_v53 = vpop.f32.mrf.mxu3  ;;  %v1024_v55 = vpop.f32.mrf.mxu2 }
 0x134   :  { %v1174_v56 = vpack.c.bf16 %v1169_v51, %v1169_v51  ;;  %v1011_v57 = vpop.f32.mrf.mxu1 }
 0x136   :  { %v1048_v60 = vpop.f32.mrf.mxu0  ;;  %1511 = vmatmul.bf16.vlgmr.msra.gmra.mxu2 %v1174_v56 }
 0x13b   :  { %v1035_v63 = vpop.f32.mrf.mxu3 }
 0x13c   :  { %v1036_v1 = vadd.f32 %v1035_v63, %v1023_v62  ;;  %v1061_v2 = vpop.f32.mrf.mxu1  ;;  %v1074_v3 = vpop.f32.mrf.mxu2 }
 0x13d   :  { %v1062_v15 = vadd.f32 %v1061_v2, %v342_v9 }
 0x13e   :  { %v1049_v4 = vadd.f32 %v1048_v60, %v1036_v1  ;;  %v1050_v5 = vpop.f32.mrf.mxu0 }
 0x13f   :  { %v1075_v18 = vadd.f32 %v1074_v3, %v1062_v15 }
 0x140   :  { %v1170_v7 = vmax.f32 %v1049_v4, 0.0 }
 0x142   :  { %v1175_v8 = vpack.c.bf16 %v1170_v7, %v1170_v7 }
 0x143   :  { %v1037_v10 = vpop.f32.mrf.mxu3 }
 0x144   :  { %v1063_v11 = vpop.f32.mrf.mxu1  ;;  %v1076_v12 = vpop.f32.mrf.mxu2  ;;  %1524 = vmatmul.bf16.vlgmr.msra.gmra.mxu3 %v1175_v8 }
 0x146   :  { %v1100_v14 = vpop.f32.mrf.mxu0 }
 0x147   :  { %v1101_v19 = vadd.f32 %v1100_v14, %v343_v16 }
 0x14c   :  { %v1087_v20 = vpop.f32.mrf.mxu3  ;;  %v1113_v21 = vpop.f32.mrf.mxu1 }
 0x14d   :  { %v1088_v22 = vadd.f32 %v1087_v20, %v1075_v18  ;;  %v1114_v33 = vadd.f32 %v1113_v21, %v1101_v19 }
 0x14e   :  { %v1126_v54 = vpop.f32.mrf.mxu2  ;;  %v1102_v23 = vpop.f32.mrf.mxu0 }
 0x14f   :  { %v1171_v24 = vmax.f32 %v1088_v22, 0.0  ;;  %v1127_v25 = vadd.f32 %v1126_v54, %v1114_v33 }
 0x151   :  { %v1176_v28 = vpack.c.bf16 %v1171_v24, %v1171_v24  ;;  %v1172_v29 = vmax.f32 %v1127_v25, 0.0 }
 0x153   :  { %v1177_v30 = vpack.c.bf16 %v1172_v29, %v1172_v29  ;;  %1537 = vmatmul.bf16.vlgmr.msrb.gmra.mxu0 %v1176_v28 }
 0x154   :  { %v1089_v31 = vpop.f32.mrf.mxu3  ;;  %v1115_v32 = vpop.f32.mrf.mxu1 }
 0x155   :  { %1550 = vmatmul.bf16.vlgmr.msrb.gmra.mxu1 %v1177_v30 }
 0x156   :  { %v1128_v34 = vpop.f32.mrf.mxu2 }
 0x166   :  { %v1152_v36 = vpop.f32.mrf.mxu0 }
 0x16c   :  { %v1139_v38 = vpop.f32.mrf.mxu3  ;;  %v1165_v39 = vpop.f32.mrf.mxu1 }
 0x16d   :  { %v1140_v40 = vadd.f32 %v1139_v38, %v344_v37 }
 0x16e   :  { %v1154_v42 = vpop.f32.mrf.mxu0 }
 0x16f   :  { %v1153_v41 = vadd.f32 %v1152_v36, %v1140_v40 }
 0x171   :  { %v1166_v43 = vadd.f32 %v1165_v39, %v1153_v41 }
 0x173   :  { %v1173_v44 = vmax.f32 %v1166_v43, 0.0 }
 0x174   :  { %v1141_v45 = vpop.f32.mrf.mxu3  ;;  %v1167_v46 = vpop.f32.mrf.mxu1 }
 0x175   :  { %v1178_v47 = vpack.c.bf16 %v1173_v44, %v1173_v44 }
 0x177   :  { %1563 = vmatmul.bf16.vlgmr.msrb.gmra.mxu2 %v1178_v47 }
 0x1b9   :  { %v1512_v48 = vpop.f32.mrf.mxu2 }
 0x1ba   :  { %v1513_v57 = vadd.f32 %v2449_v35, %v1512_v48 }
 0x1c1   :  { %v1514_v49 = vpop.f32.mrf.mxu2 }
 0x1c7   :  { %v1525_v50 = vpop.f32.mrf.mxu3 }
 0x1c8   :  { %v1526_v58 = vadd.f32 %v1525_v50, %v1513_v57 }
 0x1cf   :  { %v1527_v51 = vpop.f32.mrf.mxu3 }
 0x1d0   :  { %v1538_v52 = vpop.f32.mrf.mxu0 }
 0x1d1   :  { %v1539_v60 = vadd.f32 %v1538_v52, %v1526_v58 }
 0x1d2   :  { %v1551_v53 = vpop.f32.mrf.mxu1 }
 0x1d3   :  { %v1552_v62 = vadd.f32 %v1551_v53, %v1539_v60 }
 0x1d8   :  { %v1540_v55 = vpop.f32.mrf.mxu0 }
 0x1da   :  { %v1553_v56 = vpop.f32.mrf.mxu1 }
 0x1fa   :  { %v1564_v63 = vpop.f32.mrf.mxu2 }
 0x1fb   :  { %v1565_v0 = vadd.f32 %v1564_v63, %v1552_v62 }
 0x1fd   :  { %v1571_v1 = vmul.f32 2.0, %v1565_v0 }
 0x1ff   :  { %v1572_v2 = vsel %vm1570_vm1, %v1571_v1, %v1565_v0 }
 0x200   :  { %v2271_v3 = vmul.f32 -1.442695, %v1572_v2 }
 0x202   :  { %2450 = vpow2.f32 %v2271_v3  ;;  %v1566_v4 = vpop.f32.mrf.mxu2 }
 0x208   :  { %v2451_v5 = vpop.eup %2450 }
 0x209   :  { %v1576_v6 = vadd.f32 1.0, %v2451_v5 }
 0x20b   :  { %2452 = vrcp.f32 %v1576_v6  ;;  %v1588_v10 = vand.u32 2147483648, %v1576_v6  ;;  %v1586_v12 = vand.u32 2147483647, %v1576_v6  ;;  %vm1582_vm3 = vweird.f32 %v1576_v6 }
 0x20d   :  { %v1589_v14 = vor.u32 1.1754944e-38, %v1588_v10  ;;  %vm1587_vm5 = vcmp.eq.f32.partialorder %v1586_v12, 8.507059e+37 }
 0x211   :  { %v2453_v7 = vpop.eup %2452 }
 0x212   :  { %v1578_v8 = vmul.f32 %v2453_v7, %v1576_v6  ;;  %vm1583_vm2 = vweird.f32 %v2453_v7 }
 0x213   :  { %vm1584_vm4 = vmor %vm1582_vm3, %vm1583_vm2 }
 0x214   :  { %v1579_v9 = vsub.f32 1.0, %v1578_v8 }
 0x216   :  { %v1580_v11 = vmul.f32 %v2453_v7, %v1579_v9 }
 0x218   :  { %v1581_v13 = vadd.f32 %v2453_v7, %v1580_v11 }
 0x21a   :  { %v1585_v15 = vsel %vm1584_vm4, %v2453_v7, %v1581_v13 }
 0x21b   :  { %v1590_v16 = vsel %vm1587_vm5, %v1589_v14, %v1585_v15 }
 0x21c   :  { %v1592_v17 = vmul.f32 2.0, %v1590_v16 }
 0x21e   :  { %v2272_v18 = vadd.f32 -1.0, %v1592_v17 }
 0x220   :  { %v1594_v19 = vsel %vm1570_vm1, %v2272_v18, %v1590_v16 }
 0x221   :  { %1595 = vst [vmem:[#allocation13] sm:$0xff] %v1594_v19 }
 0x222   :  { %1606 = dma.vmem_to_hbm [thread:$0]  %s1602_s10, 128, %s1604_s13, [#allocation4]  }
 0x223   :  { %2630 = dma.done.wait [#allocation4], 128  }
 0x224   :  { %2631 = vsyncadd [#allocation4], 4294967168 }
 0x225   :  { %1611 = vsyncpa [#allocation3], 1 }
 0x226   :  { %1612 = vsyncpa [#allocation6], 1 }
 0x227   :  { %1613 = vsyncpa [#allocation9], 1 }
 0x228   :  { %1614 = vsyncpa [#allocation12], 1 }
 0x229   :  { %1615 = vsyncpa [#allocation4], 1 }

</bundles_post_ra>
